<compile_context>
chip_gen: v7x
topology: tpu7x:2x2x1
jax: 0.10.0
libtpu: 0.0.40
codegen_flags: <defaults>
</compile_context>

<pallas_src>
import functools

import jax
import jax.numpy as jnp
from jax.experimental import pallas as pl
from jax.experimental.pallas import tpu as pltpu

_EPS = 1e-5
EXPANSION = 4
_MAX_ROW_TILE = 256                 # rows per block for the 1x1-conv kernels
_VMEM_LIMIT = 32 * 1024 * 1024      # safe on v5e/v6e/v7x


def _compiler_params(semantics):
    return pltpu.CompilerParams(dimension_semantics=semantics,
                                vmem_limit_bytes=_VMEM_LIMIT)


def _pick_row_tile(m):
    for t in (_MAX_ROW_TILE, 128, 64, 32, 16, 8):
        if m % t == 0:
            return t
    return m


def _vec_spec(c):      # (1, C) per-channel vector, same block every step
    return pl.BlockSpec((1, c), lambda i: (0, 0))


def _stat_spec(c):     # (2, C) [sum; sumsq] accumulator output
    return pl.BlockSpec((2, c), lambda i: (0, 0))


def _sum_sumsq(y):
    return jnp.concatenate([jnp.sum(y, axis=0, keepdims=True),
                            jnp.sum(y * y, axis=0, keepdims=True)], axis=0)


# ----------------------------------------------------------------------------
# Kernels
# ----------------------------------------------------------------------------
def _conv1x1_stats_kernel(x_ref, w_ref, y_ref, st_ref, acc_ref):
    """conv1 (1x1): y = x @ w (bf16 -> f32) + per-channel sum/sumsq stats."""
    i = pl.program_id(0)

    @pl.when(i == 0)
    def _init():
        acc_ref[...] = jnp.zeros_like(acc_ref)

    y = jnp.dot(x_ref[...], w_ref[...], preferred_element_type=jnp.float32)
    y_ref[...] = y
    acc_ref[...] += _sum_sumsq(y)

    @pl.when(i == pl.num_programs(0) - 1)
    def _fin():
        st_ref[...] = acc_ref[...]


def _conv3x3_stats_kernel(y1_ref, sc_ref, sh_ref, w_ref, y2_ref, st_ref,
                          xp_ref, acc_ref, *, stride):
    """BN1+ReLU (fused input) -> 3x3 conv as a single im2col matmul + stats."""
    i = pl.program_id(0)
    _, h, w, c = y1_ref.shape
    _, ho, wo, cout = y2_ref.shape

    @pl.when(i == 0)
    def _init():
        xp_ref[...] = jnp.zeros_like(xp_ref)   # zero halo once (scratch persists)
        acc_ref[...] = jnp.zeros_like(acc_ref)

    # Normalize + ReLU the previous stage's raw conv output on the fly.
    a = jnp.maximum(y1_ref[0] * sc_ref[...].reshape(1, 1, c)
                    + sh_ref[...].reshape(1, 1, c), 0.0).astype(jnp.bfloat16)
    xp_ref[pl.ds(1, h), pl.ds(1, w), :] = a     # interior of padded slab

    # im2col: one (Ho*Wo, 9*C) tile -> single MXU matmul with K = 9*C.
    xp = xp_ref[...]
    taps = []
    for di in range(3):
        for dj in range(3):
            if stride == 1:
                taps.append(xp[di:di + ho, dj:dj + wo, :])
            else:
                # TODO(synk): strided tap extraction causes cross-sublane
                # relayouts; fold the stride into the data layout if stride=2
                # stages become hot.
                taps.append(jax.lax.slice(
                    xp, (di, dj, 0),
                    (di + (ho - 1) * stride + 1, dj + (wo - 1) * stride + 1, c),
                    (stride, stride, 1)))
    cols = jnp.concatenate(taps, axis=-1).reshape(ho * wo, 9 * c)
    y2 = jnp.dot(cols, w_ref[...], preferred_element_type=jnp.float32)
    y2_ref[...] = y2.reshape(1, ho, wo, cout)

    acc_ref[...] += _sum_sumsq(y2)

    @pl.when(i == pl.num_programs(0) - 1)
    def _fin():
        st_ref[...] = acc_ref[...]


def _tail_stats_proj_kernel(y2_ref, sc2_ref, sh2_ref, w3_ref, xs_ref, ws_ref,
                            st3_ref, sts_ref, a3_ref, as_ref):
    """Pass A of the fused tail: stats of conv3 and of the shortcut conv."""
    i = pl.program_id(0)

    @pl.when(i == 0)
    def _init():
        a3_ref[...] = jnp.zeros_like(a3_ref)
        as_ref[...] = jnp.zeros_like(as_ref)

    a2 = jnp.maximum(y2_ref[...] * sc2_ref[...] + sh2_ref[...],
                     0.0).astype(jnp.bfloat16)
    y3 = jnp.dot(a2, w3_ref[...], preferred_element_type=jnp.float32)
    ys = jnp.dot(xs_ref[...], ws_ref[...], preferred_element_type=jnp.float32)
    a3_ref[...] += _sum_sumsq(y3)
    as_ref[...] += _sum_sumsq(ys)

    @pl.when(i == pl.num_programs(0) - 1)
    def _fin():
        st3_ref[...] = a3_ref[...]
        sts_ref[...] = as_ref[...]


def _tail_stats_ident_kernel(y2_ref, sc2_ref, sh2_ref, w3_ref, st3_ref, a3_ref):
    i = pl.program_id(0)

    @pl.when(i == 0)
    def _init():
        a3_ref[...] = jnp.zeros_like(a3_ref)

    a2 = jnp.maximum(y2_ref[...] * sc2_ref[...] + sh2_ref[...],
                     0.0).astype(jnp.bfloat16)
    y3 = jnp.dot(a2, w3_ref[...], preferred_element_type=jnp.float32)
    a3_ref[...] += _sum_sumsq(y3)

    @pl.when(i == pl.num_programs(0) - 1)
    def _fin():
        st3_ref[...] = a3_ref[...]


def _tail_out_proj_kernel(y2_ref, sc2_ref, sh2_ref, w3_ref, sc3_ref, sh3_ref,
                          xs_ref, ws_ref, scs_ref, shs_ref, o_ref):
    """Pass B: BN2+ReLU -> conv3 -> BN3, + shortcut conv -> BN_s, + add, ReLU."""
    a2 = jnp.maximum(y2_ref[...] * sc2_ref[...] + sh2_ref[...],
                     0.0).astype(jnp.bfloat16)
    y3 = jnp.dot(a2, w3_ref[...], preferred_element_type=jnp.float32)
    ys = jnp.dot(xs_ref[...], ws_ref[...], preferred_element_type=jnp.float32)
    out = (y3 * sc3_ref[...] + sh3_ref[...]
           + ys * scs_ref[...] + shs_ref[...])
    o_ref[...] = jnp.maximum(out, 0.0)


def _tail_out_ident_kernel(y2_ref, sc2_ref, sh2_ref, w3_ref, sc3_ref, sh3_ref,
                           xid_ref, o_ref):
    a2 = jnp.maximum(y2_ref[...] * sc2_ref[...] + sh2_ref[...],
                     0.0).astype(jnp.bfloat16)
    y3 = jnp.dot(a2, w3_ref[...], preferred_element_type=jnp.float32)
    out = y3 * sc3_ref[...] + sh3_ref[...] + xid_ref[...]
    o_ref[...] = jnp.maximum(out, 0.0)


# ----------------------------------------------------------------------------
# pallas_call wrappers
# ----------------------------------------------------------------------------
def _conv1x1_stats(x2d_bf16, w_bf16):
    m, cin = x2d_bf16.shape
    cout = w_bf16.shape[1]
    tm = _pick_row_tile(m)
    return pl.pallas_call(
        _conv1x1_stats_kernel,
        out_shape=(jax.ShapeDtypeStruct((m, cout), jnp.float32),
                   jax.ShapeDtypeStruct((2, cout), jnp.float32)),
        grid=(m // tm,),
        in_specs=[pl.BlockSpec((tm, cin), lambda i: (i, 0)),
                  pl.BlockSpec((cin, cout), lambda i: (0, 0))],
        out_specs=(pl.BlockSpec((tm, cout), lambda i: (i, 0)),
                   _stat_spec(cout)),
        scratch_shapes=[pltpu.VMEM((2, cout), jnp.float32)],
        compiler_params=_compiler_params(("arbitrary",)),
    )(x2d_bf16, w_bf16)


def _conv3x3_stats(y1_4d, scale1, shift1, w2_flat_bf16, *, stride):
    n, h, w, c = y1_4d.shape
    cout = w2_flat_bf16.shape[1]
    ho = (h + 2 - 3) // stride + 1
    wo = (w + 2 - 3) // stride + 1
    return pl.pallas_call(
        functools.partial(_conv3x3_stats_kernel, stride=stride),
        out_shape=(jax.ShapeDtypeStruct((n, ho, wo, cout), jnp.float32),
                   jax.ShapeDtypeStruct((2, cout), jnp.float32)),
        grid=(n,),
        in_specs=[pl.BlockSpec((1, h, w, c), lambda i: (i, 0, 0, 0)),
                  _vec_spec(c), _vec_spec(c),
                  pl.BlockSpec((9 * c, cout), lambda i: (0, 0))],
        out_specs=(pl.BlockSpec((1, ho, wo, cout), lambda i: (i, 0, 0, 0)),
                   _stat_spec(cout)),
        scratch_shapes=[pltpu.VMEM((h + 2, w + 2, c), jnp.bfloat16),
                        pltpu.VMEM((2, cout), jnp.float32)],
        compiler_params=_compiler_params(("arbitrary",)),
    )(y1_4d, scale1, shift1, w2_flat_bf16)


def _tail_stats(y2, sc2, sh2, w3, xs=None, ws=None):
    m, c = y2.shape
    cout = w3.shape[1]
    tm = _pick_row_tile(m)
    grid = (m // tm,)
    if ws is not None:
        cin = xs.shape[1]
        return pl.pallas_call(
            _tail_stats_proj_kernel,
            out_shape=(jax.ShapeDtypeStruct((2, cout), jnp.float32),
                       jax.ShapeDtypeStruct((2, cout), jnp.float32)),
            grid=grid,
            in_specs=[pl.BlockSpec((tm, c), lambda i: (i, 0)),
                      _vec_spec(c), _vec_spec(c),
                      pl.BlockSpec((c, cout), lambda i: (0, 0)),
                      pl.BlockSpec((tm, cin), lambda i: (i, 0)),
                      pl.BlockSpec((cin, cout), lambda i: (0, 0))],
            out_specs=(_stat_spec(cout), _stat_spec(cout)),
            scratch_shapes=[pltpu.VMEM((2, cout), jnp.float32),
                            pltpu.VMEM((2, cout), jnp.float32)],
            compiler_params=_compiler_params(("arbitrary",)),
        )(y2, sc2, sh2, w3, xs, ws)
    st3 = pl.pallas_call(
        _tail_stats_ident_kernel,
        out_shape=jax.ShapeDtypeStruct((2, cout), jnp.float32),
        grid=grid,
        in_specs=[pl.BlockSpec((tm, c), lambda i: (i, 0)),
                  _vec_spec(c), _vec_spec(c),
                  pl.BlockSpec((c, cout), lambda i: (0, 0))],
        out_specs=_stat_spec(cout),
        scratch_shapes=[pltpu.VMEM((2, cout), jnp.float32)],
        compiler_params=_compiler_params(("arbitrary",)),
    )(y2, sc2, sh2, w3)
    return st3, None


def _tail_out(y2, sc2, sh2, w3, sc3, sh3, shortcut, ws=None, scs=None, shs=None):
    m, c = y2.shape
    cout = w3.shape[1]
    tm = _pick_row_tile(m)
    grid = (m // tm,)
    row = lambda width: pl.BlockSpec((tm, width), lambda i: (i, 0))
    if ws is not None:
        cin = shortcut.shape[1]
        return pl.pallas_call(
            _tail_out_proj_kernel,
            out_shape=jax.ShapeDtypeStruct((m, cout), jnp.float32),
            grid=grid,
            in_specs=[row(c), _vec_spec(c), _vec_spec(c),
                      pl.BlockSpec((c, cout), lambda i: (0, 0)),
                      _vec_spec(cout), _vec_spec(cout),
                      row(cin),
                      pl.BlockSpec((cin, cout), lambda i: (0, 0)),
                      _vec_spec(cout), _vec_spec(cout)],
            out_specs=row(cout),
            compiler_params=_compiler_params(("parallel",)),
        )(y2, sc2, sh2, w3, sc3, sh3, shortcut, ws, scs, shs)
    return pl.pallas_call(
        _tail_out_ident_kernel,
        out_shape=jax.ShapeDtypeStruct((m, cout), jnp.float32),
        grid=grid,
        in_specs=[row(c), _vec_spec(c), _vec_spec(c),
                  pl.BlockSpec((c, cout), lambda i: (0, 0)),
                  _vec_spec(cout), _vec_spec(cout),
                  row(cout)],
        out_specs=row(cout),
        compiler_params=_compiler_params(("parallel",)),
    )(y2, sc2, sh2, w3, sc3, sh3, shortcut)


# ----------------------------------------------------------------------------
# Parameter init (deterministic, synthetic) + forward
# ----------------------------------------------------------------------------
def init_bottleneck_params(key, in_planes, planes, stride=1):
    out_planes = EXPANSION * planes
    k1, k2, k3, k4 = jax.random.split(key, 4)
    ones = lambda c: jnp.ones((1, c), jnp.float32)
    zeros = lambda c: jnp.zeros((1, c), jnp.float32)
    params = {
        # conv weights stored as (Cin, Cout) / (kh, kw, Cin, Cout) [HWIO]
        "w1": 0.1 * jax.random.normal(k1, (in_planes, planes), jnp.float32),
        "g1": ones(planes), "b1": zeros(planes),
        "w2": 0.1 * jax.random.normal(k2, (3, 3, planes, planes), jnp.float32),
        "g2": ones(planes), "b2": zeros(planes),
        "w3": 0.1 * jax.random.normal(k3, (planes, out_planes), jnp.float32),
        "g3": ones(out_planes), "b3": zeros(out_planes),
    }
    if stride != 1 or in_planes != out_planes:
        params["ws"] = 0.1 * jax.random.normal(k4, (in_planes, out_planes),
                                               jnp.float32)
        params["gs"] = ones(out_planes)
        params["bs"] = zeros(out_planes)
    return params


def _bn_affine(stats, gamma, beta, count):
    """Per-channel scale/shift from accumulated [sum; sumsq] batch statistics."""
    mean = stats[0:1, :] / count
    var = jnp.maximum(stats[1:2, :] / count - mean * mean, 0.0)
    scale = gamma * jax.lax.rsqrt(var + _EPS)
    shift = beta - mean * scale
    return scale, shift


def bottleneck_forward(params, x_nchw, *, stride=1):
    x = jnp.transpose(x_nchw, (0, 2, 3, 1)).astype(jnp.float32)   # NCHW -> NHWC
    n, h, w, cin = x.shape
    planes = params["w1"].shape[1]
    out_planes = params["w3"].shape[1]
    m0 = n * h * w
    ho = (h + 2 - 3) // stride + 1
    wo = (w + 2 - 3) // stride + 1
    m1 = n * ho * wo

    x2d_bf = x.reshape(m0, cin).astype(jnp.bfloat16)
    w1 = params["w1"].astype(jnp.bfloat16)
    w2 = params["w2"].reshape(9 * planes, planes).astype(jnp.bfloat16)
    w3 = params["w3"].astype(jnp.bfloat16)

    # Stage 1: conv1 (1x1) raw output + batch stats
    y1, st1 = _conv1x1_stats(x2d_bf, w1)
    sc1, sh1 = _bn_affine(st1, params["g1"], params["b1"], m0)

    # Stage 2: BN1+ReLU fused into 3x3 conv (im2col), raw output + stats
    y2_4d, st2 = _conv3x3_stats(y1.reshape(n, h, w, planes), sc1, sh1, w2,
                                stride=stride)
    sc2, sh2 = _bn_affine(st2, params["g2"], params["b2"], m1)
    y2 = y2_4d.reshape(m1, planes)

    # Stage 3 + shortcut, fused: pass A (stats only), pass B (fused output)
    if "ws" in params:
        ws = params["ws"].astype(jnp.bfloat16)
        xs = x[:, ::stride, ::stride, :].reshape(m1, cin).astype(jnp.bfloat16)
        st3, sts = _tail_stats(y2, sc2, sh2, w3, xs, ws)
        sc3, sh3 = _bn_affine(st3, params["g3"], params["b3"], m1)
        scs, shs = _bn_affine(sts, params["gs"], params["bs"], m1)
        out2d = _tail_out(y2, sc2, sh2, w3, sc3, sh3, xs, ws, scs, shs)
    else:
        assert stride == 1 and cin == out_planes, \
            "identity shortcut requires stride==1 and in_planes==4*planes"
        xid = x.reshape(m0, cin)                    # f32 identity shortcut
        st3, _ = _tail_stats(y2, sc2, sh2, w3)
        sc3, sh3 = _bn_affine(st3, params["g3"], params["b3"], m1)
        out2d = _tail_out(y2, sc2, sh2, w3, sc3, sh3, xid)

    out = out2d.reshape(n, ho, wo, out_planes)
    return jnp.transpose(out, (0, 3, 1, 2))         # NHWC -> NCHW


# ----------------------------------------------------------------------------
# Pure-JAX f32 reference (sanity check for the Pallas kernels)
# ----------------------------------------------------------------------------
def _bn_train_ref(y, gamma, beta):
    mean = jnp.mean(y, axis=(0, 1, 2), keepdims=True)
    var = jnp.mean((y - mean) ** 2, axis=(0, 1, 2), keepdims=True)
    return (gamma.reshape(1, 1, 1, -1) * (y - mean) * jax.lax.rsqrt(var + _EPS)
            + beta.reshape(1, 1, 1, -1))


def reference_forward(params, x_nchw, *, stride=1):
    x = jnp.transpose(x_nchw, (0, 2, 3, 1))
    dn = ("NHWC", "HWIO", "NHWC")
    conv = lambda a, w, s, pad: jax.lax.conv_general_dilated(
        a, w, (s, s), pad, dimension_numbers=dn)
    cin = x.shape[-1]
    planes = params["w1"].shape[1]
    out_planes = params["w3"].shape[1]

    a1 = jax.nn.relu(_bn_train_ref(
        conv(x, params["w1"].reshape(1, 1, cin, planes), 1, "VALID"),
        params["g1"], params["b1"]))
    a2 = jax.nn.relu(_bn_train_ref(
        conv(a1, params["w2"], stride, [(1, 1), (1, 1)]),
        params["g2"], params["b2"]))
    a3 = _bn_train_ref(
        conv(a2, params["w3"].reshape(1, 1, planes, out_planes), 1, "VALID"),
        params["g3"], params["b3"])
    if "ws" in params:
        sc = _bn_train_ref(
            conv(x, params["ws"].reshape(1, 1, cin, out_planes), stride,
                 "VALID"),
            params["gs"], params["bs"])
    else:
        sc = x
    out = jax.nn.relu(a3 + sc)
    return jnp.transpose(out, (0, 3, 1, 2))


if __name__ == "__main__":
    key = jax.random.PRNGKey(0)

    configs = [
        (4, 4, 1),    # projection shortcut (in_planes != 4*planes)
        (16, 4, 1),   # identity shortcut  (in_planes == 4*planes, stride == 1)
    ]
    for idx, (in_planes, planes, stride) in enumerate(configs):
        kx, kp = jax.random.split(jax.random.fold_in(key, idx))
        x = jax.random.normal(kx, (2, in_planes, 16, 16), jnp.float32)
        params = init_bottleneck_params(kp, in_planes, planes, stride)

        out = jax.block_until_ready(bottleneck_forward(params, x, stride=stride))
        spatial = (16 + 2 - 3) // stride + 1
        assert out.shape == (2, EXPANSION * planes, spatial, spatial), out.shape

        ref = reference_forward(params, x, stride=stride)
        if not bool(jnp.allclose(out, ref, atol=5e-2, rtol=5e-2)):
            err = float(jnp.max(jnp.abs(out - ref)))
            raise AssertionError(
                f"Pallas Bottleneck mismatch (config {idx}): max|diff|={err}")

    print("KERNEL_OK")
</pallas_src>

<mosaic_0001>
module attributes {stable_mosaic.version = 11 : i64} {
  func.func @_conv1x1_stats_kernel(%arg0: i32, %arg1: memref<256x4xbf16, #tpu.memory_space<vmem>>, %arg2: memref<4x4xbf16, #tpu.memory_space<vmem>>, %arg3: memref<256x4xf32, #tpu.memory_space<vmem>>, %arg4: memref<2x4xf32, #tpu.memory_space<vmem>>, %arg5: memref<2x4xf32, #tpu.memory_space<vmem>>) attributes {dimension_semantics = [#tpu.dimension_semantics<arbitrary>], iteration_bounds = array<i64: 2>, scalar_prefetch = 0 : i64, scratch_operands = 1 : i64, tpu.core_type = #tpu.core_type<tc>, window_params = [{transform_indices = @transform_0, window_bounds = array<i64: 256, 4>}, {pipeline_mode = #tpu.pipeline_mode<synchronous>, transform_indices = @transform_1, window_bounds = array<i64: 4, 4>}, {transform_indices = @transform_2, window_bounds = array<i64: 256, 4>}, {pipeline_mode = #tpu.pipeline_mode<synchronous>, transform_indices = @transform_3, window_bounds = array<i64: 2, 4>}]} {
    %c0_i32 = arith.constant 0 : i32
    %0 = arith.cmpi eq, %arg0, %c0_i32 : i32
    %1 = arith.extui %0 : i1 to i32
    %c0_i32_0 = arith.constant 0 : i32
    %2 = arith.cmpi ne, %1, %c0_i32_0 : i32
    scf.if %2 {
      %cst_13 = arith.constant 0.000000e+00 : f32
      %19 = vector.broadcast %cst_13 : f32 to vector<2x4xf32>
      %c0_14 = arith.constant 0 : index
      %c0_15 = arith.constant 0 : index
      %20 = vector.load %arg5[%c0_14, %c0_15] : memref<2x4xf32, #tpu.memory_space<vmem>>, vector<2x4xf32>
      tpu.vector_store %arg5[%c0_14, %c0_15], %19 {strides = array<i32>} : memref<2x4xf32, #tpu.memory_space<vmem>>, vector<2x4xf32>,
    } else {
    }
    %c0 = arith.constant 0 : index
    %c0_1 = arith.constant 0 : index
    %3 = vector.load %arg1[%c0, %c0_1] : memref<256x4xbf16, #tpu.memory_space<vmem>>, vector<256x4xbf16>
    %c0_2 = arith.constant 0 : index
    %c0_3 = arith.constant 0 : index
    %4 = vector.load %arg2[%c0_2, %c0_3] : memref<4x4xbf16, #tpu.memory_space<vmem>>, vector<4x4xbf16>
    %cst = arith.constant dense<0.000000e+00> : vector<256x4xf32>
    %5 = tpu.matmul %3, %4, %cst {dimension_numbers = #tpu.dot_dimension_numbers<[1], [0], [0], [1], [0, 0, 1, 1], [], []>} : vector<256x4xbf16>, vector<4x4xbf16>, vector<256x4xf32> -> vector<256x4xf32>
    %c0_4 = arith.constant 0 : index
    %c0_5 = arith.constant 0 : index
    %6 = vector.load %arg3[%c0_4, %c0_5] : memref<256x4xf32, #tpu.memory_space<vmem>>, vector<256x4xf32>
    tpu.vector_store %arg3[%c0_4, %c0_5], %5 {strides = array<i32>} : memref<256x4xf32, #tpu.memory_space<vmem>>, vector<256x4xf32>,
    %c0_6 = arith.constant 0 : index
    %c0_7 = arith.constant 0 : index
    %7 = vector.load %arg5[%c0_6, %c0_7] : memref<2x4xf32, #tpu.memory_space<vmem>>, vector<2x4xf32>
    %cst_8 = arith.constant dense<0.000000e+00> : vector<4xf32>
    %8 = vector.multi_reduction <add>, %5, %cst_8 [0] : vector<256x4xf32> to vector<4xf32>
    %9 = vector.shape_cast %8 : vector<4xf32> to vector<1x4xf32>
    %10 = arith.mulf %5, %5 : vector<256x4xf32>
    %cst_9 = arith.constant dense<0.000000e+00> : vector<4xf32>
    %11 = vector.multi_reduction <add>, %10, %cst_9 [0] : vector<256x4xf32> to vector<4xf32>
    %12 = vector.shape_cast %11 : vector<4xf32> to vector<1x4xf32>
    %13 = tpu.concatenate %9, %12 in 0 : vector<1x4xf32>, vector<1x4xf32> -> vector<2x4xf32>
    %14 = arith.addf %7, %13 : vector<2x4xf32>
    %c0_10 = arith.constant 0 : index
    %c0_11 = arith.constant 0 : index
    %15 = vector.load %arg5[%c0_10, %c0_11] : memref<2x4xf32, #tpu.memory_space<vmem>>, vector<2x4xf32>
    tpu.vector_store %arg5[%c0_10, %c0_11], %14 {strides = array<i32>} : memref<2x4xf32, #tpu.memory_space<vmem>>, vector<2x4xf32>,
    %c1_i32 = arith.constant 1 : i32
    %16 = arith.cmpi eq, %arg0, %c1_i32 : i32
    %17 = arith.extui %16 : i1 to i32
    %c0_i32_12 = arith.constant 0 : i32
    %18 = arith.cmpi ne, %17, %c0_i32_12 : i32
    scf.if %18 {
      %c0_13 = arith.constant 0 : index
      %c0_14 = arith.constant 0 : index
      %19 = vector.load %arg5[%c0_13, %c0_14] : memref<2x4xf32, #tpu.memory_space<vmem>>, vector<2x4xf32>
      %c0_15 = arith.constant 0 : index
      %c0_16 = arith.constant 0 : index
      %20 = vector.load %arg4[%c0_15, %c0_16] : memref<2x4xf32, #tpu.memory_space<vmem>>, vector<2x4xf32>
      tpu.vector_store %arg4[%c0_15, %c0_16], %19 {strides = array<i32>} : memref<2x4xf32, #tpu.memory_space<vmem>>, vector<2x4xf32>,
    } else {
    }
    return
  }
  func.func @transform_0(%arg0: i32) -> (i32, i32) {
    %c0_i32 = arith.constant 0 : i32
    %c0_i32_0 = arith.constant 0 : i32
    return %arg0, %c0_i32 : i32, i32
  }
  func.func @transform_1(%arg0: i32) -> (i32, i32) {
    %c0_i32 = arith.constant 0 : i32
    %c0_i32_0 = arith.constant 0 : i32
    %c0_i32_1 = arith.constant 0 : i32
    return %c0_i32, %c0_i32_0 : i32, i32
  }
  func.func @transform_2(%arg0: i32) -> (i32, i32) {
    %c0_i32 = arith.constant 0 : i32
    %c0_i32_0 = arith.constant 0 : i32
    return %arg0, %c0_i32 : i32, i32
  }
  func.func @transform_3(%arg0: i32) -> (i32, i32) {
    %c0_i32 = arith.constant 0 : i32
    %c0_i32_0 = arith.constant 0 : i32
    %c0_i32_1 = arith.constant 0 : i32
    return %c0_i32, %c0_i32_0 : i32, i32
  }
}

</mosaic_0001>

<bundles_post_ra>
// kernel: tpu_custom_call.1
= control target key start
LH: loop header
LB: loop body
LE: loop exit
PB: predicated region body
PF: predicated region fallthrough
CT: control target
= control target key end

     0   :  { %9 = vsyncpa [#allocation4], 0  ;;  %s995_s12 = smov 0   ;;  %s1303_s0 = inlined_call_operand.vmem [shape: bf16[512,4], index: 0, kind: input, shape index: {}]   ;;  %s1304_s1 = inlined_call_operand.vmem [shape: bf16[4,4], index: 1, kind: input, shape index: {}]   ;;  %s1305_s2 = inlined_call_operand.vmem [shape: f32[512,4], index: 2, kind: output, shape index: {0}]   ;;  %s1306_s3 = inlined_call_operand.hbm [shape: f32[2,4], index: 3, kind: output, shape index: {1}]  }
   0x1 LB: > { %s1001_s13 = sadd.s32 4294967295, %s971_s12   ;;  %p805_p0 = scmp.ge.s32.totalorder %s971_s12, 1  ;;  %s971_s12 = sphi %s995_s12, %s15_s12  }
   0x2   : > { %p137_p1 = scmp.lt.s32.totalorder %s971_s12, 3 }
   0x4   : > { %p138_p2 = pnand %p805_p0, %p137_p1 }
   0x5   : > { %s806_s14 = sshll.u32 (!%p138_p2), %s1001_s13, 5  ;;  %p810_p4 = scmp.ne.s32.totalorder (!%p138_p2), %s1001_s13, 0 }
   0x6   : > { %141 = sbr.rel (%p138_p2) target bundleno = 354 (0x162), region = 28  ;;  %p162_p3 = scmp.lt.s32.totalorder (!%p138_p2), %s806_s14, 63 }
   0xd   : > { %s1308_s14 = smov (!%p162_p3, %s806_s14), 63  ;;  %177 = sbr.rel (%p810_p4) target bundleno = 20 (0x14), region = 32 }
   0xe   : > { %s807_s15 = sshll.u32 %s1308_s14, 2  ;;  %s809_s16 = sshll.u32 %s1308_s14, 3  ;;  %vm178_vm0 = vcmask (!%p810_p4), 25600   ;;  %v973_v0 = vmov (!%p810_p4), 0.0  }
   0xf   : > { %s1009_s19 = scalar_lea.vmem %s1303_s0, %s807_s15  ;;  %s1014_s22 = scalar_lea.vmem %s1305_s2, %s809_s16  ;;  %179 = vst.msk [vmem:[#allocation2] sm:$0x3] (!%p810_p4), %vm178_vm0, %v973_v0 }
  0x14 PF: > { %v212_v1 = vld [vmem:[%s1304_s1] sm:$0x3]  ;;  %vm342_vm1 = vcmask 1041408   ;;  %vm293_vm2 = vcmask 31744   ;;  %v920_v4 = vld [vmem:[%s1009_s19 + $0x8] sm:$0xff]   ;;  %v921_v5 = vld [vmem:[%s1009_s19 + $0x10] sm:$0xff]  }
  0x15   : > { %v919_v2 = vld [vmem:[%s1009_s19] sm:$0xff]   ;;  %901 = vmatprep.subr.msk.bf16.mxu0 %vm342_vm1, %v212_v1  ;;  %v344_v3 = vsel %vm342_vm1, %v212_v1, 0  ;;  %902 = vmatprep.subr.msk.bf16.mxu1 %vm342_vm1, %v212_v1  ;;  %v922_v6 = vld [vmem:[%s1009_s19 + $0x18] sm:$0xff]   ;;  %v928_v9 = vld [vmem:[%s1009_s19 + $0x48] sm:$0xff]   ;;  %vm710_vm3 = vcmask 1040384   ;;  %vm713_vm4 = vcmask 25600  }
  0x16   : > { %866 = vmatpush3.bf16.msra.mxu0 %v344_v3  ;;  %867 = vmatprep.mubr.msk.bf16.mxu0 %vm293_vm2, %v919_v2  ;;  %v923_v7 = vld [vmem:[%s1009_s19 + $0x20] sm:$0xff]   ;;  %v929_v10 = vld [vmem:[%s1009_s19 + $0x50] sm:$0xff]   ;;  %v930_v11 = vld [vmem:[%s1009_s19 + $0x58] sm:$0xff]   ;;  %p843_p5 = scmp.ne.s32.totalorder %s1001_s13, 1 }
  0x17   : > { %900 = vmatpush3.bf16.msra.mxu1 %v344_v3  ;;  %v927_v8 = vld [vmem:[%s1009_s19 + $0x40] sm:$0xff]   ;;  %v924_v12 = vld [vmem:[%s1009_s19 + $0x28] sm:$0xff]   ;;  %v925_v14 = vld [vmem:[%s1009_s19 + $0x30] sm:$0xff]  }
  0x18   : > { %883 = vmatprep.mubr.msk.bf16.mxu1 %vm293_vm2, %v927_v8  ;;  %v931_v13 = vld [vmem:[%s1009_s19 + $0x60] sm:$0xff]   ;;  %v932_v15 = vld [vmem:[%s1009_s19 + $0x68] sm:$0xff]   ;;  %v926_v16 = vld [vmem:[%s1009_s19 + $0x38] sm:$0xff]  }
  0x19   : > { %868 = vmatmul.mubr.msk.bf16.vlgmr.msra.gmra.mrb[0].mxu0 %vm293_vm2, %v920_v4  ;;  %v933_v17 = vld [vmem:[%s1009_s19 + $0x70] sm:$0xff]   ;;  %v934_v18 = vld [vmem:[%s1009_s19 + $0x78] sm:$0xff]  }
  0x1a   : > { %871 = vmatprep.mubr.msk.bf16.mxu0 %vm293_vm2, %v921_v5  ;;  %884 = vmatmul.mubr.msk.bf16.vlgmr.msra.gmra.mrb[0].mxu1 %vm293_vm2, %v928_v9 }
  0x1b   : > { %887 = vmatprep.mubr.msk.bf16.mxu1 %vm293_vm2, %v929_v10 }
  0x21   : > { %872 = vmatmul.mubr.msk.bf16.gmra.mrb[4].mxu0 %vm293_vm2, %v922_v6 }
  0x22   : > { %875 = vmatprep.mubr.msk.bf16.mxu0 %vm293_vm2, %v923_v7  ;;  %888 = vmatmul.mubr.msk.bf16.gmra.mrb[4].mxu1 %vm293_vm2, %v930_v11 }
  0x23   : > { %891 = vmatprep.mubr.msk.bf16.mxu1 %vm293_vm2, %v931_v13 }
  0x29   : > { %876 = vmatmul.mubr.msk.bf16.gmra.mrb[8].mxu0 %vm293_vm2, %v924_v12 }
  0x2a   : > { %879 = vmatprep.mubr.msk.bf16.mxu0 %vm293_vm2, %v925_v14  ;;  %892 = vmatmul.mubr.msk.bf16.gmra.mrb[8].mxu1 %vm293_vm2, %v932_v15 }
  0x2b   : > { %895 = vmatprep.mubr.msk.bf16.mxu1 %vm293_vm2, %v933_v17 }
  0x31   : > { %880 = vmatmul.mubr.msk.bf16.gmra.mrb[12].mxu0 %vm293_vm2, %v926_v16 }
  0x32   : > { %896 = vmatmul.mubr.msk.bf16.gmra.mrb[12].mxu1 %vm293_vm2, %v934_v18 }
  0xec   : > { %v869_v19 = vpop.f32.mrb[0].mxu0 }
  0xed   : > { %509 = vst.msk [vmem:[%s1014_s22 + $0x10] sm:$0xff] %vm293_vm2, %v869_v19  ;;  %v380_v20 = vpop.f32.mrb[1].mxu0  ;;  %v611_v24 = vmul.f32 %v869_v19, %v869_v19  ;;  %v543_v29 = vsel %vm293_vm2, %v869_v19, 0.0  ;;  %v1065_v35 = vpop.f32.mrb[0].mxu1 }
  0xee   : > { %507 = vst.msk [vmem:[%s1014_s22] sm:$0xff] %vm293_vm2, %v380_v20  ;;  %v609_v21 = vmul.f32 %v380_v20, %v380_v20  ;;  %v870_v22 = vpop.f32.mrb[2].mxu0  ;;  %v540_v25 = vsel %vm293_vm2, %v380_v20, 0.0  ;;  %525 = vst.msk [vmem:[%s1014_s22 + $0x90] sm:$0xff] %vm293_vm2, %v1065_v35  ;;  %v1072_v39 = vpop.f32.mrb[1].mxu1 }
  0xef   : > { %510 = vst.msk [vmem:[%s1014_s22 + $0x18] sm:$0xff] %vm293_vm2, %v870_v22  ;;  %v383_v23 = vpop.f32.mrb[3].mxu0  ;;  %v612_v31 = vmul.f32 %v870_v22, %v870_v22  ;;  %v644_v36 = vsel %vm293_vm2, %v611_v24, 0.0  ;;  %v545_v37 = vsel %vm293_vm2, %v870_v22, 0.0  ;;  %523 = vst.msk [vmem:[%s1014_s22 + $0x80] sm:$0xff] %vm293_vm2, %v1072_v39  ;;  %v1079_v43 = vpop.f32.mrb[2].mxu1 }
  0xf0   : > { %508 = vst.msk [vmem:[%s1014_s22 + $0x8] sm:$0xff] %vm293_vm2, %v383_v23  ;;  %v541_v26 = vsel %vm293_vm2, %v383_v23, 0.0  ;;  %v610_v27 = vmul.f32 %v383_v23, %v383_v23  ;;  %v641_v30 = vsel %vm293_vm2, %v609_v21, 0.0  ;;  %526 = vst.msk [vmem:[%s1014_s22 + $0x98] sm:$0xff] %vm293_vm2, %v1079_v43  ;;  %v1088_v48 = vpop.f32.mrb[3].mxu1 }
  0xf1   : > { %v542_v28 = vadd.f32 %v541_v26, %v540_v25  ;;  %v646_v44 = vsel %vm293_vm2, %v612_v31, 0.0  ;;  %524 = vst.msk [vmem:[%s1014_s22 + $0x88] sm:$0xff] %vm293_vm2, %v1088_v48 }
  0xf2   : > { %v642_v32 = vsel %vm293_vm2, %v610_v27, 0.0 }
  0xf3   : > { %v544_v33 = vadd.f32 %v543_v29, %v542_v28  ;;  %v643_v34 = vadd.f32 %v642_v32, %v641_v30 }
  0xf4   : > { %v873_v38 = vpop.f32.mrb[4].mxu0 }
  0xf5   : > { %v645_v40 = vadd.f32 %v644_v36, %v643_v34  ;;  %513 = vst.msk [vmem:[%s1014_s22 + $0x30] sm:$0xff] %vm293_vm2, %v873_v38  ;;  %v396_v41 = vpop.f32.mrb[5].mxu0  ;;  %v546_v42 = vadd.f32 %v545_v37, %v544_v33  ;;  %v615_v52 = vmul.f32 %v873_v38, %v873_v38  ;;  %v551_v58 = vsel %vm293_vm2, %v873_v38, 0.0  ;;  %v1101_v63 = vpop.f32.mrb[4].mxu1 }
  0xf6   : > { %511 = vst.msk [vmem:[%s1014_s22 + $0x20] sm:$0xff] %vm293_vm2, %v396_v41  ;;  %v547_v45 = vsel %vm293_vm2, %v396_v41, 0.0  ;;  %v613_v46 = vmul.f32 %v396_v41, %v396_v41  ;;  %v874_v47 = vpop.f32.mrb[6].mxu0  ;;  %529 = vst.msk [vmem:[%s1014_s22 + $0xb0] sm:$0xff] %vm293_vm2, %v1101_v63  ;;  %v1108_v3 = vpop.f32.mrb[5].mxu1 }
  0xf7   : > { %v548_v49 = vadd.f32 %v547_v45, %v546_v42  ;;  %v647_v50 = vadd.f32 %v646_v44, %v645_v40  ;;  %514 = vst.msk [vmem:[%s1014_s22 + $0x38] sm:$0xff] %vm293_vm2, %v874_v47  ;;  %v399_v51 = vpop.f32.mrb[7].mxu0  ;;  %v616_v59 = vmul.f32 %v874_v47, %v874_v47  ;;  %v652_v0 = vsel %vm293_vm2, %v615_v52, 0.0  ;;  %527 = vst.msk [vmem:[%s1014_s22 + $0xa0] sm:$0xff] %vm293_vm2, %v1108_v3  ;;  %v1115_v7 = vpop.f32.mrb[6].mxu1 }
  0xf8   : > { %v648_v53 = vsel %vm293_vm2, %v613_v46, 0.0  ;;  %512 = vst.msk [vmem:[%s1014_s22 + $0x28] sm:$0xff] %vm293_vm2, %v399_v51  ;;  %v549_v54 = vsel %vm293_vm2, %v399_v51, 0.0  ;;  %v614_v55 = vmul.f32 %v399_v51, %v399_v51  ;;  %v553_v1 = vsel %vm293_vm2, %v874_v47, 0.0  ;;  %530 = vst.msk [vmem:[%s1014_s22 + $0xb8] sm:$0xff] %vm293_vm2, %v1115_v7  ;;  %v1124_v12 = vpop.f32.mrb[7].mxu1 }
  0xf9   : > { %v649_v56 = vadd.f32 %v648_v53, %v647_v50  ;;  %v550_v57 = vadd.f32 %v549_v54, %v548_v49  ;;  %v654_v8 = vsel %vm293_vm2, %v616_v59, 0.0  ;;  %528 = vst.msk [vmem:[%s1014_s22 + $0xa8] sm:$0xff] %vm293_vm2, %v1124_v12 }
  0xfa   : > { %v650_v60 = vsel %vm293_vm2, %v614_v55, 0.0 }
  0xfb   : > { %v552_v61 = vadd.f32 %v551_v58, %v550_v57  ;;  %v651_v62 = vadd.f32 %v650_v60, %v649_v56  ;;  %v625_v57 = vmul.f32 %v1072_v39, %v1072_v39 }
  0xfc   : > { %v877_v2 = vpop.f32.mrb[8].mxu0 }
  0xfd   : > { %v653_v4 = vadd.f32 %v652_v0, %v651_v62  ;;  %517 = vst.msk [vmem:[%s1014_s22 + $0x50] sm:$0xff] %vm293_vm2, %v877_v2  ;;  %v412_v5 = vpop.f32.mrb[9].mxu0  ;;  %v554_v6 = vadd.f32 %v553_v1, %v552_v61  ;;  %v619_v16 = vmul.f32 %v877_v2, %v877_v2  ;;  %v559_v22 = vsel %vm293_vm2, %v877_v2, 0.0  ;;  %v1137_v27 = vpop.f32.mrb[8].mxu1 }
  0xfe   : > { %515 = vst.msk [vmem:[%s1014_s22 + $0x40] sm:$0xff] %vm293_vm2, %v412_v5  ;;  %v555_v9 = vsel %vm293_vm2, %v412_v5, 0.0  ;;  %v617_v10 = vmul.f32 %v412_v5, %v412_v5  ;;  %v878_v11 = vpop.f32.mrb[10].mxu0  ;;  %533 = vst.msk [vmem:[%s1014_s22 + $0xd0] sm:$0xff] %vm293_vm2, %v1137_v27  ;;  %v1144_v31 = vpop.f32.mrb[9].mxu1  ;;  %v571_v0 = vsel %vm293_vm2, %v1072_v39, 0.0 }
  0xff   : > { %v556_v13 = vadd.f32 %v555_v9, %v554_v6  ;;  %v655_v14 = vadd.f32 %v654_v8, %v653_v4  ;;  %518 = vst.msk [vmem:[%s1014_s22 + $0x58] sm:$0xff] %vm293_vm2, %v878_v11  ;;  %v415_v15 = vpop.f32.mrb[11].mxu0  ;;  %v620_v23 = vmul.f32 %v878_v11, %v878_v11  ;;  %v660_v28 = vsel %vm293_vm2, %v619_v16, 0.0  ;;  %531 = vst.msk [vmem:[%s1014_s22 + $0xc0] sm:$0xff] %vm293_vm2, %v1144_v31  ;;  %v1151_v36 = vpop.f32.mrb[10].mxu1 }
 0x100   : > { %v656_v17 = vsel %vm293_vm2, %v617_v10, 0.0  ;;  %516 = vst.msk [vmem:[%s1014_s22 + $0x48] sm:$0xff] %vm293_vm2, %v415_v15  ;;  %v557_v18 = vsel %vm293_vm2, %v415_v15, 0.0  ;;  %v618_v19 = vmul.f32 %v415_v15, %v415_v15  ;;  %v561_v29 = vsel %vm293_vm2, %v878_v11, 0.0  ;;  %534 = vst.msk [vmem:[%s1014_s22 + $0xd8] sm:$0xff] %vm293_vm2, %v1151_v36  ;;  %v1160_v42 = vpop.f32.mrb[11].mxu1 }
 0x101   : > { %v657_v20 = vadd.f32 %v656_v17, %v655_v14  ;;  %v558_v21 = vadd.f32 %v557_v18, %v556_v13  ;;  %v662_v37 = vsel %vm293_vm2, %v620_v23, 0.0  ;;  %532 = vst.msk [vmem:[%s1014_s22 + $0xc8] sm:$0xff] %vm293_vm2, %v1160_v42  ;;  %v672_v8 = vsel %vm293_vm2, %v625_v57, 0.0 }
 0x102   : > { %v658_v24 = vsel %vm293_vm2, %v618_v19, 0.0  ;;  %v626_v9 = vmul.f32 %v1088_v48, %v1088_v48  ;;  %v627_v13 = vmul.f32 %v1065_v35, %v1065_v35  ;;  %v573_v14 = vsel %vm293_vm2, %v1088_v48, 0.0 }
 0x103   : > { %v560_v25 = vadd.f32 %v559_v22, %v558_v21  ;;  %v659_v26 = vadd.f32 %v658_v24, %v657_v20  ;;  %v575_v17 = vsel %vm293_vm2, %v1065_v35, 0.0  ;;  %v628_v18 = vmul.f32 %v1079_v43, %v1079_v43 }
 0x104   : > { %v881_v30 = vpop.f32.mrb[12].mxu0  ;;  %v674_v19 = vsel %vm293_vm2, %v626_v9, 0.0  ;;  %v629_v20 = vmul.f32 %v1108_v3, %v1108_v3  ;;  %v676_v23 = vsel %vm293_vm2, %v627_v13, 0.0  ;;  %v577_v48 = vsel %vm293_vm2, %v1079_v43, 0.0 }
 0x105   : > { %v661_v32 = vadd.f32 %v660_v28, %v659_v26  ;;  %521 = vst.msk [vmem:[%s1014_s22 + $0x70] sm:$0xff] %vm293_vm2, %v881_v30  ;;  %v428_v33 = vpop.f32.mrb[13].mxu0  ;;  %v562_v34 = vadd.f32 %v561_v29, %v560_v25  ;;  %v623_v47 = vmul.f32 %v881_v30, %v881_v30  ;;  %v567_v54 = vsel %vm293_vm2, %v881_v30, 0.0  ;;  %v1175_v60 = vpop.f32.mrb[12].mxu1 }
 0x106   : > { %519 = vst.msk [vmem:[%s1014_s22 + $0x60] sm:$0xff] %vm293_vm2, %v428_v33  ;;  %v563_v38 = vsel %vm293_vm2, %v428_v33, 0.0  ;;  %v621_v40 = vmul.f32 %v428_v33, %v428_v33  ;;  %v882_v41 = vpop.f32.mrb[14].mxu0  ;;  %537 = vst.msk [vmem:[%s1014_s22 + $0xf0] sm:$0xff] %vm293_vm2, %v1175_v60  ;;  %v1184_v1 = vpop.f32.mrb[13].mxu1  ;;  %v579_v24 = vsel %vm293_vm2, %v1108_v3, 0.0  ;;  %v630_v29 = vmul.f32 %v1124_v12, %v1124_v12 }
 0x107   : > { %v564_v44 = vadd.f32 %v563_v38, %v562_v34  ;;  %v663_v45 = vadd.f32 %v662_v37, %v661_v32  ;;  %522 = vst.msk [vmem:[%s1014_s22 + $0x78] sm:$0xff] %vm293_vm2, %v882_v41  ;;  %v431_v46 = vpop.f32.mrb[15].mxu0  ;;  %v624_v55 = vmul.f32 %v882_v41, %v882_v41  ;;  %v668_v61 = vsel %vm293_vm2, %v623_v47, 0.0  ;;  %535 = vst.msk [vmem:[%s1014_s22 + $0xe0] sm:$0xff] %vm293_vm2, %v1184_v1  ;;  %v1189_v5 = vpop.f32.mrb[14].mxu1 }
 0x108   : > { %v664_v49 = vsel %vm293_vm2, %v621_v40, 0.0  ;;  %520 = vst.msk [vmem:[%s1014_s22 + $0x68] sm:$0xff] %vm293_vm2, %v431_v46  ;;  %v565_v50 = vsel %vm293_vm2, %v431_v46, 0.0  ;;  %v622_v51 = vmul.f32 %v431_v46, %v431_v46  ;;  %v569_v62 = vsel %vm293_vm2, %v882_v41, 0.0  ;;  %538 = vst.msk [vmem:[%s1014_s22 + $0xf8] sm:$0xff] %vm293_vm2, %v1189_v5  ;;  %v1198_v39 = vpop.f32.mrb[15].mxu1 }
 0x109   : > { %v665_v52 = vadd.f32 %v664_v49, %v663_v45  ;;  %v566_v53 = vadd.f32 %v565_v50, %v564_v44  ;;  %v670_v6 = vsel %vm293_vm2, %v624_v55, 0.0  ;;  %536 = vst.msk [vmem:[%s1014_s22 + $0xe8] sm:$0xff] %vm293_vm2, %v1198_v39  ;;  %v678_v26 = vsel %vm293_vm2, %v628_v18, 0.0 }
 0x10a   : > { %v666_v56 = vsel %vm293_vm2, %v622_v51, 0.0  ;;  %v680_v28 = vsel %vm293_vm2, %v629_v20, 0.0  ;;  %v631_v33 = vmul.f32 %v1101_v63, %v1101_v63  ;;  %v581_v43 = vsel %vm293_vm2, %v1124_v12, 0.0 }
 0x10b   : > { %v568_v58 = vadd.f32 %v567_v54, %v566_v53  ;;  %v667_v59 = vadd.f32 %v666_v56, %v665_v52  ;;  %v583_v3 = vsel %vm293_vm2, %v1101_v63, 0.0  ;;  %v632_v38 = vmul.f32 %v1115_v7, %v1115_v7 }
 0x10c   : > { %v682_v40 = vsel %vm293_vm2, %v630_v29, 0.0  ;;  %v633_v41 = vmul.f32 %v1144_v31, %v1144_v31  ;;  %v684_v46 = vsel %vm293_vm2, %v631_v33, 0.0  ;;  %v585_v12 = vsel %vm293_vm2, %v1115_v7, 0.0 }
 0x10d   : > { %v669_v2 = vadd.f32 %v668_v61, %v667_v59  ;;  %v570_v4 = vadd.f32 %v569_v62, %v568_v58  ;;  %v587_v47 = vsel %vm293_vm2, %v1144_v31, 0.0  ;;  %v686_v50 = vsel %vm293_vm2, %v632_v38, 0.0 }
 0x10e   : > { %v688_v51 = vsel %vm293_vm2, %v633_v41, 0.0  ;;  %v634_v52 = vmul.f32 %v1160_v42, %v1160_v42  ;;  %v635_v55 = vmul.f32 %v1137_v27, %v1137_v27  ;;  %v589_v7 = vsel %vm293_vm2, %v1160_v42, 0.0 }
 0x10f   : > { %v572_v10 = vadd.f32 %v571_v0, %v570_v4  ;;  %v671_v11 = vadd.f32 %v670_v6, %v669_v2  ;;  %v591_v31 = vsel %vm293_vm2, %v1137_v27, 0.0  ;;  %v636_v58 = vmul.f32 %v1151_v36, %v1151_v36 }
 0x110   : > { %v690_v59 = vsel %vm293_vm2, %v634_v52, 0.0  ;;  %v637_v61 = vmul.f32 %v1184_v1, %v1184_v1  ;;  %v692_v2 = vsel %vm293_vm2, %v635_v55, 0.0  ;;  %v593_v42 = vsel %vm293_vm2, %v1151_v36, 0.0 }
 0x111   : > { %v673_v15 = vadd.f32 %v672_v8, %v671_v11  ;;  %v574_v16 = vadd.f32 %v573_v14, %v572_v10  ;;  %v595_v4 = vsel %vm293_vm2, %v1184_v1, 0.0  ;;  %v694_v8 = vsel %vm293_vm2, %v636_v58, 0.0 }
 0x112   : > { %v696_v9 = vsel %vm293_vm2, %v637_v61, 0.0  ;;  %v638_v10 = vmul.f32 %v1198_v39, %v1198_v39  ;;  %v639_v14 = vmul.f32 %v1175_v60, %v1175_v60  ;;  %v597_v36 = vsel %vm293_vm2, %v1198_v39, 0.0 }
 0x113   : > { %v576_v21 = vadd.f32 %v575_v17, %v574_v16  ;;  %v675_v22 = vadd.f32 %v674_v19, %v673_v15  ;;  %v599_v1 = vsel %vm293_vm2, %v1175_v60, 0.0  ;;  %v640_v17 = vmul.f32 %v1189_v5, %v1189_v5 }
 0x114   : > { %v698_v18 = vsel %vm293_vm2, %v638_v10, 0.0 }
 0x115   : > { %v677_v25 = vadd.f32 %v676_v23, %v675_v22  ;;  %v578_v35 = vadd.f32 %v577_v48, %v576_v21  ;;  %v700_v21 = vsel %vm293_vm2, %v639_v14, 0.0  ;;  %v601_v22 = vsel %vm293_vm2, %v1189_v5, 0.0 }
 0x116   : > { %v702_v39 = vsel %vm293_vm2, %v640_v17, 0.0 }
 0x117   : > { %v580_v30 = vadd.f32 %v579_v24, %v578_v35  ;;  %v679_v32 = vadd.f32 %v678_v26, %v677_v25 }
 0x119   : > { %v681_v34 = vadd.f32 %v680_v28, %v679_v32  ;;  %v582_v37 = vadd.f32 %v581_v43, %v580_v30 }
 0x11b   : > { %v584_v44 = vadd.f32 %v583_v3, %v582_v37  ;;  %v683_v45 = vadd.f32 %v682_v40, %v681_v34  ;;  %v539_v34 = vld [vmem:[#allocation2] sm:$0x3] }
 0x11d   : > { %v685_v49 = vadd.f32 %v684_v46, %v683_v45  ;;  %v586_v63 = vadd.f32 %v585_v12, %v584_v44 }
 0x11f   : > { %v588_v53 = vadd.f32 %v587_v47, %v586_v63  ;;  %v687_v54 = vadd.f32 %v686_v50, %v685_v49 }
 0x121   : > { %v689_v56 = vadd.f32 %v688_v51, %v687_v54  ;;  %v590_v57 = vadd.f32 %v589_v7, %v588_v53 }
 0x123   : > { %v592_v62 = vadd.f32 %v591_v31, %v590_v57  ;;  %v691_v0 = vadd.f32 %v690_v59, %v689_v56 }
 0x125   : > { %v693_v6 = vadd.f32 %v692_v2, %v691_v0  ;;  %v594_v27 = vadd.f32 %v593_v42, %v592_v62 }
 0x127   : > { %v596_v11 = vadd.f32 %v595_v4, %v594_v27  ;;  %v695_v13 = vadd.f32 %v694_v8, %v693_v6 }
 0x129   : > { %v697_v15 = vadd.f32 %v696_v9, %v695_v13  ;;  %v598_v16 = vadd.f32 %v597_v36, %v596_v11 }
 0x12b   : > { %v600_v19 = vadd.f32 %v599_v1, %v598_v16  ;;  %v699_v20 = vadd.f32 %v698_v18, %v697_v15 }
 0x12d   : > { %v602_v23 = vadd.f32 %v601_v22, %v600_v19  ;;  %v701_v48 = vadd.f32 %v700_v21, %v699_v20 }
 0x12f   : > { %v603_v24 = vrot.slane %v602_v23, 4  ;;  %v703_v25 = vadd.f32 %v702_v39, %v701_v48 }
 0x131   : > { %v604_v35 = vadd.f32 %v603_v24, %v602_v23  ;;  %v704_v60 = vrot.slane %v703_v25, 4 }
 0x133   : > { %v605_v26 = vrot.slane %v604_v35, 2  ;;  %v705_v28 = vadd.f32 %v704_v60, %v703_v25 }
 0x135   : > { %v606_v29 = vadd.f32 %v605_v26, %v604_v35  ;;  %v706_v30 = vrot.slane %v705_v28, 2 }
 0x137   : > { %v607_v32 = vrot.slane %v606_v29, 1  ;;  %v707_v33 = vadd.f32 %v706_v30, %v705_v28 }
 0x139   : > { %v708_v43 = vrot.slane %v707_v33, 1  ;;  %v608_v37 = vadd.f32 %v607_v32, %v606_v29 }
 0x13a   : > { %718 = sbr.rel (%p843_p5) target bundleno = 329 (0x149), region = 36 }
 0x13b   : > { %v709_v3 = vadd.f32 %v708_v43, %v707_v33 }
 0x13d   : > { %v711_v5 = vsel %vm710_vm3, %v608_v37, %v709_v3 }
 0x13e   : > { %v712_v38 = vadd.f32 %v711_v5, %v539_v34 }
 0x140   : > { %714 = vst.msk [vmem:[#allocation2] sm:$0x3] %vm713_vm4, %v712_v38 }
 0x147   : > { %v719_v40 = vld [vmem:[#allocation2] sm:$0x3] }
 0x148   : > { %720 = vst.msk [vmem:[#allocation3] sm:$0x3] %vm713_vm4, %v719_v40 }
 0x149 PF: > { %p907_p6 = scmp.eq.s32.totalorder %s1001_s13, 1  ;;  %s974_s25 = smov [#allocation3]  }
 0x14a   : > { %s737_s26 = sshll.u32 %s974_s25, 4  ;;  %s738_s26 = int_to_ptr.vmem [resolvable:$true] %s737_s26 }
 0x14b   : > { %s935_s27 = scalar_lea.vmem %s738_s26, 32  ;;  %p942_p10 = scmp.lt.s32.totalorder %s738_s26, %s738_s26 }
 0x14c   : > { %p936_p7 = scmp.ne.s32.totalorder %s738_s26, %s935_s27  ;;  %p943_p11 = scmp.lt.s32.totalorder %s935_s27, %s935_s27 }
 0x14e   : > { %p937_p8 = pnand %p936_p7, %p907_p6  ;;  %p944_p12 = por %p943_p11, %p942_p10 }
 0x150   : > { %p938_p9 = pneg %p937_p8 }
 0x152   : > { %p945_p13 = pnand %p944_p12, %p938_p9 }
 0x154   : > { %948 = shalt.err (!%p945_p13)
}
 0x155   : > { %s949_s30 = scalar_lea.hbm %s1306_s3, 32 }
 0x156   : > { %p950_p0 = scmp.ne.s32.totalorder %s1306_s3, %s949_s30  ;;  %p955_p3 = scmp.lt.u32.totalorder %s949_s30, %s1306_s3 }
 0x158   : > { %p951_p1 = pnand %p950_p0, %p907_p6 }
 0x15a   : > { %p952_p2 = pneg %p951_p1 }
 0x15c   : > { %p957_p4 = pnand %p955_p3, %p952_p2 }
 0x15e   : > { %960 = shalt.err (!%p957_p4)
}
 0x15f   : > { %904 = dma.vmem_to_hbm [thread:$0]  (%p907_p6), %s738_s26, 32, %s1306_s3, [#allocation4]  }
 0x160   : > { %966 = dma.done.wait (%p907_p6), [#allocation4], 32  }
 0x161   : > { %968 = vsyncadd (%p907_p6), [#allocation4], 4294967264 }
 0x162 PF: > { %s15_s12 = sadd.s32 1, %s971_s12  }
 0x163   : > { %p12_p5 = scmp.ge.s32.totalorder %s15_s12, 4  }
 0x165   :  { %14 = sbr.rel (!%p12_p5) target bundleno = 1 (0x1), region = 75 }
 0x16c   :  { %758 = vsyncpa [#allocation4], 1 }
 0x16d   :  { %760 = vsyncpa [#allocation4 + $0x1], 1 }

</bundles_post_ra>
